<compile_context>
chip_gen: v6e
topology: v6e:2x2x1
jax: 0.10.0
libtpu: 0.0.40
codegen_flags: <defaults>
</compile_context>

<pallas_src>
import functools

import jax
import jax.numpy as jnp
import numpy as np
from jax.experimental import pallas as pl
from jax.experimental.pallas import tpu as pltpu

# Feed the MXU bf16 operands (f32 accumulation) on v6e/v7x once the conv is compute-bound.
# Kept False here so the kernel matches the f32 PyTorch module to 2e-4.
USE_BF16_MXU = False


def downsample_kernel(x_ref, w_ref, gamma_ref, beta_ref, out_ref, col_sc, *, Ho, Wo):
    # x_ref    : (4, Cin, NP)   stride-2 spatial phases, lane-dense:
    #                           x_ref[a*2+b, c, n*Ho*Wo + i*Wo + j] = x[n, c, 2i+a, 2j+b]
    # w_ref    : (Cconv, 9*Cin) conv weight, columns ordered (kh, kw, cin)
    # gamma_ref: (Cout, 1)      BN scale
    # beta_ref : (Cout, 1)      BN shift
    # out_ref  : (Cout, NP)     lane-dense output (channels on sublanes)
    # col_sc   : (9*Cin, NP)    VMEM scratch: lane-dense im2col matrix
    _, Cin, NP = x_ref.shape
    Cconv = w_ref.shape[0]

    # The 4 spatial phases (each already lane-dense (Cin, NP)).
    p00 = x_ref[0]   # x[.., 2i,   2j  ]
    p01 = x_ref[1]   # x[.., 2i,   2j+1]
    p10 = x_ref[2]   # x[.., 2i+1, 2j  ]
    p11 = x_ref[3]   # x[.., 2i+1, 2j+1]

    # Boundary masks along the flattened (n, ho, wo) lane axis.
    lane = jax.lax.broadcasted_iota(jnp.int32, (Cin, NP), 1)
    img = lane % (Ho * Wo)            # index within one image
    valid_w = (img % Wo) >= 1         # wo >= 1 : a (wo-1) shift stays inside the row
    valid_h = img >= Wo               # ho >= 1 : a (ho-1) shift stays inside the image

    def shifted(phase, shift, mask):
        # output[p] = phase[p - shift]; lanes where the shift would cross a row/image
        # boundary (the conv's zero padding) are masked to 0, so the rotate's wrap-around
        # never leaks data.
        return jnp.where(mask, pltpu.roll(phase, shift, axis=1), 0.0)

    # The 9 conv taps, ordered t = kh*3 + kw to match the (kh, kw, cin) weight columns.
    taps = (
        shifted(p11, Wo + 1, valid_h & valid_w),   # (kh=0, kw=0)
        shifted(p10, Wo, valid_h),                 # (kh=0, kw=1)
        shifted(p11, Wo, valid_h),                 # (kh=0, kw=2)
        shifted(p01, 1, valid_w),                  # (kh=1, kw=0)
        p00,                                       # (kh=1, kw=1)
        p01,                                       # (kh=1, kw=2)
        shifted(p11, 1, valid_w),                  # (kh=2, kw=0)
        p10,                                       # (kh=2, kw=1)
        p11,                                       # (kh=2, kw=2)
    )

    # Lane-dense im2col: each tap write is Cin full-128-lane sublane rows (unmasked vst).
    for t, tap in enumerate(taps):
        col_sc[t * Cin:(t + 1) * Cin, :] = tap

    # conv as ONE MXU matmul: (Cconv, 9*Cin) x (9*Cin, NP) -> (Cconv, NP).
    col = col_sc[...]
    if USE_BF16_MXU:
        conv = jax.lax.dot_general(
            w_ref[...].astype(jnp.bfloat16), col.astype(jnp.bfloat16),
            dimension_numbers=(((1,), (0,)), ((), ())),
            preferred_element_type=jnp.float32)
    else:
        conv = jax.lax.dot_general(
            w_ref[...], col,
            dimension_numbers=(((1,), (0,)), ((), ())),
            preferred_element_type=jnp.float32)

    # 2x2 / stride-2 max-pool = max over the 4 interior phases, taken while they are
    # still in vregs (padding zeros never enter the max; no col_sc reload, no transpose).
    pool = jnp.maximum(jnp.maximum(p00, p01), jnp.maximum(p10, p11))   # (Cin, NP)

    # Channel "concat" + BatchNorm2d (training-mode batch stats, centered two-pass
    # variance) + ReLU, fused over the full (Cout, NP) block -> single unmasked store.
    z = jnp.concatenate([conv, pool], axis=0)                          # (Cout, NP)
    inv_np = 1.0 / float(NP)
    mean = jnp.sum(z, axis=1, keepdims=True) * inv_np
    zc = z - mean
    var = jnp.sum(zc * zc, axis=1, keepdims=True) * inv_np
    y = zc * jax.lax.rsqrt(var + 1e-5) * gamma_ref[...] + beta_ref[...]
    out_ref[...] = jnp.maximum(y, 0.0).astype(out_ref.dtype)


def downsample_block(x_nchw, weight_oihw, gamma, beta):
    """x_nchw: (N, Cin, H, W) f32; weight_oihw: (Cconv, Cin, 3, 3) (PyTorch OIHW);
    gamma/beta: (Cout,) with Cout = Cconv + Cin."""
    N, Cin, H, W = x_nchw.shape
    Cconv = weight_oihw.shape[0]
    Cout = Cconv + Cin
    # Even H/W required: for odd sizes the conv and pool spatial dims differ and the
    # original module's torch.cat would fail anyway.
    assert H % 2 == 0 and W % 2 == 0, "DownsampleBlock kernel requires even H and W"
    Ho, Wo = H // 2, W // 2
    NP = N * Ho * Wo

    x = x_nchw.astype(jnp.float32)
    # Space-to-depth relayout (one XLA transpose pass, replacing the previous NCHW->NHWC
    # pass): phase (a, b) holds x[n, c, 2i+a, 2j+b], flattened lane-dense over (n, i, j).
    x_ph = jnp.transpose(
        x.reshape(N, Cin, Ho, 2, Wo, 2), (3, 5, 1, 0, 2, 4)).reshape(4, Cin, NP)
    # Conv weight -> (Cconv, 9*Cin) with columns ordered (kh, kw, cin) to match the
    # kernel's im2col rows.
    w2 = jnp.transpose(weight_oihw, (0, 2, 3, 1)).reshape(Cconv, 9 * Cin).astype(jnp.float32)
    g2 = gamma.reshape(Cout, 1).astype(jnp.float32)
    b2 = beta.reshape(Cout, 1).astype(jnp.float32)

    kernel = functools.partial(downsample_kernel, Ho=Ho, Wo=Wo)

    out_cp = pl.pallas_call(
        kernel,
        out_shape=jax.ShapeDtypeStruct((Cout, NP), jnp.float32),
        grid=(1,),
        in_specs=[
            pl.BlockSpec((4, Cin, NP), lambda i: (0, 0, 0)),
            pl.BlockSpec((Cconv, 9 * Cin), lambda i: (0, 0)),
            pl.BlockSpec((Cout, 1), lambda i: (0, 0)),
            pl.BlockSpec((Cout, 1), lambda i: (0, 0)),
        ],
        out_specs=pl.BlockSpec((Cout, NP), lambda i: (0, 0)),
        scratch_shapes=[
            pltpu.VMEM((9 * Cin, NP), jnp.float32),   # lane-dense im2col
        ],
        compiler_params=pltpu.CompilerParams(
            dimension_semantics=("arbitrary",),
            vmem_limit_bytes=32 * 1024 * 1024,
        ),
    )(x_ph, w2, g2, b2)

    # (Cout, N*Ho*Wo) -> (N, Cout, Ho, Wo)
    return jnp.transpose(out_cp.reshape(Cout, N, Ho, Wo), (1, 0, 2, 3))


def reference(x_nchw, weight_oihw, gamma, beta):
    """Pure-JAX reference mirroring the PyTorch forward (training-mode BN, eps=1e-5)."""
    conv = jax.lax.conv_general_dilated(
        x_nchw, weight_oihw, window_strides=(2, 2), padding=((1, 1), (1, 1)),
        dimension_numbers=("NCHW", "OIHW", "NCHW"))
    pool = jax.lax.reduce_window(
        x_nchw, -jnp.inf, jax.lax.max, (1, 1, 2, 2), (1, 1, 2, 2), "VALID")
    out = jnp.concatenate([conv, pool], axis=1)
    mean = jnp.mean(out, axis=(0, 2, 3), keepdims=True)
    var = jnp.mean((out - mean) ** 2, axis=(0, 2, 3), keepdims=True)
    y = (out - mean) * jax.lax.rsqrt(var + 1e-5)
    y = y * gamma.reshape(1, -1, 1, 1) + beta.reshape(1, -1, 1, 1)
    return jnp.maximum(y, 0.0)


if __name__ == "__main__":
    # Small shapes consistent with the module: batch=2, in_channels=4, out_channels=8,
    # spatial 16x16 -> output (2, 8, 8, 8) in NCHW.
    N, Cin, H, W = 2, 4, 16, 16
    Cout = 8
    Cconv = Cout - Cin

    key = jax.random.PRNGKey(0)
    kx, kw_, kg, kb = jax.random.split(key, 4)
    x = jax.random.normal(kx, (N, Cin, H, W), dtype=jnp.float32)
    weight = 0.1 * jax.random.normal(kw_, (Cconv, Cin, 3, 3), dtype=jnp.float32)  # OIHW
    gamma = 1.0 + 0.1 * jax.random.normal(kg, (Cout,), dtype=jnp.float32)
    beta = 0.05 * jax.random.normal(kb, (Cout,), dtype=jnp.float32)

    out = jax.block_until_ready(downsample_block(x, weight, gamma, beta))
    ref = jax.block_until_ready(reference(x, weight, gamma, beta))
    tol = 2e-2 if USE_BF16_MXU else 2e-4
    np.testing.assert_allclose(np.asarray(out), np.asarray(ref), rtol=tol, atol=tol)

    print("KERNEL_OK")
</pallas_src>

<mosaic_0001>
module attributes {stable_mosaic.version = 11 : i64} {
  func.func @downsample_kernel(%arg0: i32, %arg1: memref<4x4x128xf32, #tpu.memory_space<vmem>>, %arg2: memref<4x36xf32, #tpu.memory_space<vmem>>, %arg3: memref<8x1xf32, #tpu.memory_space<vmem>>, %arg4: memref<8x1xf32, #tpu.memory_space<vmem>>, %arg5: memref<8x128xf32, #tpu.memory_space<vmem>>, %arg6: memref<36x128xf32, #tpu.memory_space<vmem>>) attributes {dimension_semantics = [#tpu.dimension_semantics<arbitrary>], iteration_bounds = array<i64: 1>, scalar_prefetch = 0 : i64, scratch_operands = 1 : i64, tpu.core_type = #tpu.core_type<tc>, window_params = [{pipeline_mode = #tpu.pipeline_mode<synchronous>, transform_indices = @transform_0, window_bounds = array<i64: 4, 4, 128>}, {pipeline_mode = #tpu.pipeline_mode<synchronous>, transform_indices = @transform_1, window_bounds = array<i64: 4, 36>}, {pipeline_mode = #tpu.pipeline_mode<synchronous>, transform_indices = @transform_2, window_bounds = array<i64: 8, 1>}, {pipeline_mode = #tpu.pipeline_mode<synchronous>, transform_indices = @transform_3, window_bounds = array<i64: 8, 1>}, {pipeline_mode = #tpu.pipeline_mode<synchronous>, transform_indices = @transform_4, window_bounds = array<i64: 8, 128>}]} {
    %c0 = arith.constant 0 : index
    %c0_0 = arith.constant 0 : index
    %c0_1 = arith.constant 0 : index
    %0 = vector.load %arg1[%c0, %c0_0, %c0_1] : memref<4x4x128xf32, #tpu.memory_space<vmem>>, vector<1x4x128xf32>
    %1 = vector.shape_cast %0 : vector<1x4x128xf32> to vector<4x128xf32>
    %c1 = arith.constant 1 : index
    %c0_2 = arith.constant 0 : index
    %c0_3 = arith.constant 0 : index
    %2 = vector.load %arg1[%c1, %c0_2, %c0_3] : memref<4x4x128xf32, #tpu.memory_space<vmem>>, vector<1x4x128xf32>
    %3 = vector.shape_cast %2 : vector<1x4x128xf32> to vector<4x128xf32>
    %c2 = arith.constant 2 : index
    %c0_4 = arith.constant 0 : index
    %c0_5 = arith.constant 0 : index
    %4 = vector.load %arg1[%c2, %c0_4, %c0_5] : memref<4x4x128xf32, #tpu.memory_space<vmem>>, vector<1x4x128xf32>
    %5 = vector.shape_cast %4 : vector<1x4x128xf32> to vector<4x128xf32>
    %c3 = arith.constant 3 : index
    %c0_6 = arith.constant 0 : index
    %c0_7 = arith.constant 0 : index
    %6 = vector.load %arg1[%c3, %c0_6, %c0_7] : memref<4x4x128xf32, #tpu.memory_space<vmem>>, vector<1x4x128xf32>
    %7 = vector.shape_cast %6 : vector<1x4x128xf32> to vector<4x128xf32>
    %8 = tpu.iota {dimensions = array<i32: 1>} : vector<4x128xi32>
    %c64_i32 = arith.constant 64 : i32
    %c0_i32 = arith.constant 0 : i32
    %9 = arith.cmpi eq, %c64_i32, %c0_i32 : i32
    %c1_i32 = arith.constant 1 : i32
    %10 = arith.select %9, %c1_i32, %c64_i32 : i32
    %11 = vector.broadcast %10 : i32 to vector<4x128xi32>
    %12 = arith.remsi %8, %11 : vector<4x128xi32>
    %c0_i32_8 = arith.constant 0 : i32
    %13 = vector.broadcast %c0_i32_8 : i32 to vector<4x128xi32>
    %14 = arith.cmpi ne, %12, %13 : vector<4x128xi32>
    %c0_i32_9 = arith.constant 0 : i32
    %15 = vector.broadcast %c0_i32_9 : i32 to vector<4x128xi32>
    %16 = arith.cmpi slt, %12, %15 : vector<4x128xi32>
    %c0_i32_10 = arith.constant 0 : i32
    %17 = arith.cmpi slt, %10, %c0_i32_10 : i32
    %18 = vector.broadcast %17 : i1 to vector<4x128xi1>
    %19 = vector.broadcast %18 : vector<4x128xi1> to vector<4x128xi1>
    %20 = arith.xori %16, %19 : vector<4x128xi1>
    %21 = arith.andi %20, %14 : vector<4x128xi1>
    %22 = vector.broadcast %10 : i32 to vector<4x128xi32>
    %23 = arith.addi %12, %22 : vector<4x128xi32>
    %24 = arith.select %21, %23, %12 : vector<4x128xi1>, vector<4x128xi32>
    %c8_i32 = arith.constant 8 : i32
    %c0_i32_11 = arith.constant 0 : i32
    %25 = arith.cmpi eq, %c8_i32, %c0_i32_11 : i32
    %c1_i32_12 = arith.constant 1 : i32
    %26 = arith.select %25, %c1_i32_12, %c8_i32 : i32
    %27 = vector.broadcast %26 : i32 to vector<4x128xi32>
    %28 = arith.remsi %24, %27 : vector<4x128xi32>
    %c0_i32_13 = arith.constant 0 : i32
    %29 = vector.broadcast %c0_i32_13 : i32 to vector<4x128xi32>
    %30 = arith.cmpi ne, %28, %29 : vector<4x128xi32>
    %c0_i32_14 = arith.constant 0 : i32
    %31 = vector.broadcast %c0_i32_14 : i32 to vector<4x128xi32>
    %32 = arith.cmpi slt, %28, %31 : vector<4x128xi32>
    %c0_i32_15 = arith.constant 0 : i32
    %33 = arith.cmpi slt, %26, %c0_i32_15 : i32
    %34 = vector.broadcast %33 : i1 to vector<4x128xi1>
    %35 = vector.broadcast %34 : vector<4x128xi1> to vector<4x128xi1>
    %36 = arith.xori %32, %35 : vector<4x128xi1>
    %37 = arith.andi %36, %30 : vector<4x128xi1>
    %38 = vector.broadcast %26 : i32 to vector<4x128xi32>
    %39 = arith.addi %28, %38 : vector<4x128xi32>
    %40 = arith.select %37, %39, %28 : vector<4x128xi1>, vector<4x128xi32>
    %c1_i32_16 = arith.constant 1 : i32
    %41 = vector.broadcast %c1_i32_16 : i32 to vector<4x128xi32>
    %42 = arith.cmpi sge, %40, %41 : vector<4x128xi32>
    %c8_i32_17 = arith.constant 8 : i32
    %43 = vector.broadcast %c8_i32_17 : i32 to vector<4x128xi32>
    %44 = arith.cmpi sge, %24, %43 : vector<4x128xi32>
    %45 = arith.andi %44, %42 : vector<4x128xi1>
    %c9_i32 = arith.constant 9 : i32
    %46 = tpu.dynamic_rotate %7 by %c9_i32 dim 1 : vector<4x128xf32>, i32 -> vector<4x128xf32>
    %cst = arith.constant 0.000000e+00 : f32
    %47 = vector.broadcast %cst : f32 to vector<4x128xf32>
    %48 = arith.select %45, %46, %47 : vector<4x128xi1>, vector<4x128xf32>
    %c8_i32_18 = arith.constant 8 : i32
    %49 = tpu.dynamic_rotate %5 by %c8_i32_18 dim 1 : vector<4x128xf32>, i32 -> vector<4x128xf32>
    %cst_19 = arith.constant 0.000000e+00 : f32
    %50 = vector.broadcast %cst_19 : f32 to vector<4x128xf32>
    %51 = arith.select %44, %49, %50 : vector<4x128xi1>, vector<4x128xf32>
    %c8_i32_20 = arith.constant 8 : i32
    %52 = tpu.dynamic_rotate %7 by %c8_i32_20 dim 1 : vector<4x128xf32>, i32 -> vector<4x128xf32>
    %cst_21 = arith.constant 0.000000e+00 : f32
    %53 = vector.broadcast %cst_21 : f32 to vector<4x128xf32>
    %54 = arith.select %44, %52, %53 : vector<4x128xi1>, vector<4x128xf32>
    %c1_i32_22 = arith.constant 1 : i32
    %55 = tpu.dynamic_rotate %3 by %c1_i32_22 dim 1 : vector<4x128xf32>, i32 -> vector<4x128xf32>
    %cst_23 = arith.constant 0.000000e+00 : f32
    %56 = vector.broadcast %cst_23 : f32 to vector<4x128xf32>
    %57 = arith.select %42, %55, %56 : vector<4x128xi1>, vector<4x128xf32>
    %c1_i32_24 = arith.constant 1 : i32
    %58 = tpu.dynamic_rotate %7 by %c1_i32_24 dim 1 : vector<4x128xf32>, i32 -> vector<4x128xf32>
    %cst_25 = arith.constant 0.000000e+00 : f32
    %59 = vector.broadcast %cst_25 : f32 to vector<4x128xf32>
    %60 = arith.select %42, %58, %59 : vector<4x128xi1>, vector<4x128xf32>
    %c0_26 = arith.constant 0 : index
    %c0_27 = arith.constant 0 : index
    %61 = vector.load %arg6[%c0_26, %c0_27] : memref<36x128xf32, #tpu.memory_space<vmem>>, vector<4x128xf32>
    tpu.vector_store %arg6[%c0_26, %c0_27], %48 {strides = array<i32>} : memref<36x128xf32, #tpu.memory_space<vmem>>, vector<4x128xf32>,
    %c4 = arith.constant 4 : index
    %c0_28 = arith.constant 0 : index
    %62 = vector.load %arg6[%c4, %c0_28] : memref<36x128xf32, #tpu.memory_space<vmem>>, vector<4x128xf32>
    tpu.vector_store %arg6[%c4, %c0_28], %51 {strides = array<i32>} : memref<36x128xf32, #tpu.memory_space<vmem>>, vector<4x128xf32>,
    %c8 = arith.constant 8 : index
    %c0_29 = arith.constant 0 : index
    %63 = vector.load %arg6[%c8, %c0_29] : memref<36x128xf32, #tpu.memory_space<vmem>>, vector<4x128xf32>
    tpu.vector_store %arg6[%c8, %c0_29], %54 {strides = array<i32>} : memref<36x128xf32, #tpu.memory_space<vmem>>, vector<4x128xf32>,
    %c12 = arith.constant 12 : index
    %c0_30 = arith.constant 0 : index
    %64 = vector.load %arg6[%c12, %c0_30] : memref<36x128xf32, #tpu.memory_space<vmem>>, vector<4x128xf32>
    tpu.vector_store %arg6[%c12, %c0_30], %57 {strides = array<i32>} : memref<36x128xf32, #tpu.memory_space<vmem>>, vector<4x128xf32>,
    %c16 = arith.constant 16 : index
    %c0_31 = arith.constant 0 : index
    %65 = vector.load %arg6[%c16, %c0_31] : memref<36x128xf32, #tpu.memory_space<vmem>>, vector<4x128xf32>
    tpu.vector_store %arg6[%c16, %c0_31], %1 {strides = array<i32>} : memref<36x128xf32, #tpu.memory_space<vmem>>, vector<4x128xf32>,
    %c20 = arith.constant 20 : index
    %c0_32 = arith.constant 0 : index
    %66 = vector.load %arg6[%c20, %c0_32] : memref<36x128xf32, #tpu.memory_space<vmem>>, vector<4x128xf32>
    tpu.vector_store %arg6[%c20, %c0_32], %3 {strides = array<i32>} : memref<36x128xf32, #tpu.memory_space<vmem>>, vector<4x128xf32>,
    %c24 = arith.constant 24 : index
    %c0_33 = arith.constant 0 : index
    %67 = vector.load %arg6[%c24, %c0_33] : memref<36x128xf32, #tpu.memory_space<vmem>>, vector<4x128xf32>
    tpu.vector_store %arg6[%c24, %c0_33], %60 {strides = array<i32>} : memref<36x128xf32, #tpu.memory_space<vmem>>, vector<4x128xf32>,
    %c28 = arith.constant 28 : index
    %c0_34 = arith.constant 0 : index
    %68 = vector.load %arg6[%c28, %c0_34] : memref<36x128xf32, #tpu.memory_space<vmem>>, vector<4x128xf32>
    tpu.vector_store %arg6[%c28, %c0_34], %5 {strides = array<i32>} : memref<36x128xf32, #tpu.memory_space<vmem>>, vector<4x128xf32>,
    %c32 = arith.constant 32 : index
    %c0_35 = arith.constant 0 : index
    %69 = vector.load %arg6[%c32, %c0_35] : memref<36x128xf32, #tpu.memory_space<vmem>>, vector<4x128xf32>
    tpu.vector_store %arg6[%c32, %c0_35], %7 {strides = array<i32>} : memref<36x128xf32, #tpu.memory_space<vmem>>, vector<4x128xf32>,
    %c0_36 = arith.constant 0 : index
    %c0_37 = arith.constant 0 : index
    %70 = vector.load %arg6[%c0_36, %c0_37] : memref<36x128xf32, #tpu.memory_space<vmem>>, vector<36x128xf32>
    %c0_38 = arith.constant 0 : index
    %c0_39 = arith.constant 0 : index
    %71 = vector.load %arg2[%c0_38, %c0_39] : memref<4x36xf32, #tpu.memory_space<vmem>>, vector<4x36xf32>
    %cst_40 = arith.constant dense<0.000000e+00> : vector<4x128xf32>
    %72 = tpu.matmul %71, %70, %cst_40 {dimension_numbers = #tpu.dot_dimension_numbers<[1], [0], [0], [1], [0, 0, 1, 1], [], []>} : vector<4x36xf32>, vector<36x128xf32>, vector<4x128xf32> -> vector<4x128xf32>
    %73 = arith.maximumf %1, %3 : vector<4x128xf32>
    %74 = arith.maximumf %5, %7 : vector<4x128xf32>
    %75 = arith.maximumf %73, %74 : vector<4x128xf32>
    %76 = tpu.concatenate %72, %75 in 0 : vector<4x128xf32>, vector<4x128xf32> -> vector<8x128xf32>
    %cst_41 = arith.constant dense<0.000000e+00> : vector<8xf32>
    %77 = vector.multi_reduction <add>, %76, %cst_41 [1] : vector<8x128xf32> to vector<8xf32>
    %78 = vector.shape_cast %77 : vector<8xf32> to vector<8x1xf32>
    %cst_42 = arith.constant 7.812500e-03 : f32
    %79 = vector.broadcast %cst_42 : f32 to vector<8x1xf32>
    %80 = arith.mulf %78, %79 : vector<8x1xf32>
    %81 = vector.broadcast %80 : vector<8x1xf32> to vector<8x128xf32>
    %82 = arith.subf %76, %81 : vector<8x128xf32>
    %83 = arith.mulf %82, %82 : vector<8x128xf32>
    %cst_43 = arith.constant dense<0.000000e+00> : vector<8xf32>
    %84 = vector.multi_reduction <add>, %83, %cst_43 [1] : vector<8x128xf32> to vector<8xf32>
    %85 = vector.shape_cast %84 : vector<8xf32> to vector<8x1xf32>
    %cst_44 = arith.constant 7.812500e-03 : f32
    %86 = vector.broadcast %cst_44 : f32 to vector<8x1xf32>
    %87 = arith.mulf %85, %86 : vector<8x1xf32>
    %cst_45 = arith.constant 9.99999974E-6 : f32
    %88 = vector.broadcast %cst_45 : f32 to vector<8x1xf32>
    %89 = arith.addf %87, %88 : vector<8x1xf32>
    %90 = math.rsqrt %89 : vector<8x1xf32>
    %91 = vector.broadcast %90 : vector<8x1xf32> to vector<8x128xf32>
    %92 = arith.mulf %82, %91 : vector<8x128xf32>
    %c0_46 = arith.constant 0 : index
    %c0_47 = arith.constant 0 : index
    %93 = vector.load %arg3[%c0_46, %c0_47] : memref<8x1xf32, #tpu.memory_space<vmem>>, vector<8x1xf32>
    %94 = vector.broadcast %93 : vector<8x1xf32> to vector<8x128xf32>
    %95 = arith.mulf %92, %94 : vector<8x128xf32>
    %c0_48 = arith.constant 0 : index
    %c0_49 = arith.constant 0 : index
    %96 = vector.load %arg4[%c0_48, %c0_49] : memref<8x1xf32, #tpu.memory_space<vmem>>, vector<8x1xf32>
    %97 = vector.broadcast %96 : vector<8x1xf32> to vector<8x128xf32>
    %98 = arith.addf %95, %97 : vector<8x128xf32>
    %cst_50 = arith.constant 0.000000e+00 : f32
    %99 = vector.broadcast %cst_50 : f32 to vector<8x128xf32>
    %100 = arith.maximumf %98, %99 : vector<8x128xf32>
    %c0_51 = arith.constant 0 : index
    %c0_52 = arith.constant 0 : index
    %101 = vector.load %arg5[%c0_51, %c0_52] : memref<8x128xf32, #tpu.memory_space<vmem>>, vector<8x128xf32>
    tpu.vector_store %arg5[%c0_51, %c0_52], %100 {strides = array<i32>} : memref<8x128xf32, #tpu.memory_space<vmem>>, vector<8x128xf32>,
    return
  }
  func.func @transform_0(%arg0: i32) -> (i32, i32, i32) {
    %c0_i32 = arith.constant 0 : i32
    %c0_i32_0 = arith.constant 0 : i32
    %c0_i32_1 = arith.constant 0 : i32
    %c0_i32_2 = arith.constant 0 : i32
    return %c0_i32, %c0_i32_0, %c0_i32_1 : i32, i32, i32
  }
  func.func @transform_1(%arg0: i32) -> (i32, i32) {
    %c0_i32 = arith.constant 0 : i32
    %c0_i32_0 = arith.constant 0 : i32
    %c0_i32_1 = arith.constant 0 : i32
    return %c0_i32, %c0_i32_0 : i32, i32
  }
  func.func @transform_2(%arg0: i32) -> (i32, i32) {
    %c0_i32 = arith.constant 0 : i32
    %c0_i32_0 = arith.constant 0 : i32
    %c0_i32_1 = arith.constant 0 : i32
    return %c0_i32, %c0_i32_0 : i32, i32
  }
  func.func @transform_3(%arg0: i32) -> (i32, i32) {
    %c0_i32 = arith.constant 0 : i32
    %c0_i32_0 = arith.constant 0 : i32
    %c0_i32_1 = arith.constant 0 : i32
    return %c0_i32, %c0_i32_0 : i32, i32
  }
  func.func @transform_4(%arg0: i32) -> (i32, i32) {
    %c0_i32 = arith.constant 0 : i32
    %c0_i32_0 = arith.constant 0 : i32
    %c0_i32_1 = arith.constant 0 : i32
    return %c0_i32, %c0_i32_0 : i32, i32
  }
}

</mosaic_0001>

<bundles_post_ra>
// kernel: tpu_custom_call.1
= control target key start
LH: loop header
LB: loop body
LE: loop exit
PB: predicated region body
PF: predicated region fallthrough
CT: control target
= control target key end

     0   :  { %9 = vsyncpa [#allocation4], 0  ;;  %s362_s0 = inlined_call_operand.vmem [shape: f32[4,4,128], index: 0, kind: input, shape index: {}]   ;;  %s363_s1 = inlined_call_operand.hbm [shape: f32[4,36], index: 1, kind: input, shape index: {}]   ;;  %s364_s2 = inlined_call_operand.vmem [shape: f32[8,1], index: 2, kind: input, shape index: {}]   ;;  %s365_s3 = inlined_call_operand.vmem [shape: f32[8,1], index: 3, kind: input, shape index: {}]   ;;  %s366_s4 = inlined_call_operand.hbm [shape: f32[8,128], index: 4, kind: output, shape index: {}]  }
   0x1   :  { %10 = vsyncpa [#allocation5], 0  ;;  %s303_s15 = smov [#allocation3]  }
   0x2   :  { %s19_s16 = sshll.u32 %s303_s15, 4  ;;  %s20_s16 = int_to_ptr.vmem [resolvable:$true] %s19_s16 }
   0x3   :  { %s267_s17 = scalar_lea.vmem %s20_s16, 64  ;;  %p272_p1 = scmp.lt.s32.totalorder %s20_s16, %s20_s16 }
   0x4   :  { %p268_p0 = scmp.ne.s32.totalorder %s20_s16, %s267_s17  ;;  %p273_p2 = scmp.lt.s32.totalorder %s267_s17, %s267_s17 }
   0x6   :  { %p274_p3 = por %p273_p2, %p272_p1 }
   0x8   :  { %p275_p4 = pnand %p274_p3, %p268_p0 }
   0xa   :  { %278 = shalt.err (!%p275_p4)
}
   0xb   :  { %22 = dma.hbm_to_vmem [thread:$0]  %s363_s1, 64, %s20_s16, [#allocation4]  }
   0xc   :  { %299 = dma.done.wait [#allocation4], 64  }
   0xd   :  { %300 = vsyncadd [#allocation4], 4294967232  ;;  %v304_v0 = vmov 0.0   ;;  %v225_v1 = vld [vmem:[%s362_s0 + $0xc] sm:$0xf]  ;;  %s305_s26 = smov 1   ;;  %v37_v8 = vlaneseq }
   0xe   :  { %234 = vmatprep.subr.mxu0 %v304_v0  ;;  %v223_v2 = vld [vmem:[%s362_s0 + $0x4] sm:$0xf]  ;;  %v30_v3 = vld [vmem:[%s362_s0] sm:$0xf]  ;;  %78 = vrot.lane.b32.xlu0 %v225_v1, %s305_s26  ;;  %89 = vst [vmem:[#allocation2 + $0x20] sm:$0xf] %v225_v1 }
   0xf   :  { %75 = vrot.lane.b32.xlu1 %v223_v2, %s305_s26  ;;  %85 = vst [vmem:[#allocation2 + $0x10] sm:$0xf] %v30_v3  ;;  %86 = vst [vmem:[#allocation2 + $0x14] sm:$0xf] %v223_v2  ;;  %v174_v4 = vmax.f32 %v30_v3, %v223_v2  ;;  %v224_v5 = vld [vmem:[%s362_s0 + $0x8] sm:$0xf] }
  0x10   :  { %88 = vst [vmem:[#allocation2 + $0x1c] sm:$0xf] %v224_v5  ;;  %v175_v6 = vmax.f32 %v224_v5, %v225_v1  ;;  %s306_s28 = smov 8   ;;  %s307_s29 = smov 9   ;;  %vm100_vm0 = vcmask 1043456   ;;  %vm308_vm1 = vmmov 0  }
  0x11   :  { %244 = vmatprep.mubr.msk.f32.mxu0 %vm308_vm1, %v304_v0  ;;  %v38_v9 = vand.u32 127, %v37_v8  ;;  %v95_v25 = vld [vmem:[#allocation3] sm:$0xf]  ;;  %vm96_vm5 = vcmask 293888   ;;  %v309_v32 = vmov 0   ;;  %v199_v33 = vld [vmem:[%s365_s3] sm:$0xff] }
  0x12   :  { %72 = vrot.lane.b32.xlu0 %v225_v1, %s306_s28  ;;  %v176_v27 = vmax.f32 %v174_v4, %v175_v6  ;;  %256 = vset.pattern.permute.xlu1 %v309_v32  ;;  %v192_v38 = vld [vmem:[%s364_s2] sm:$0xff]  ;;  %s310_s3 = smov [#allocation6]  }
  0x13   :  { %66 = vrot.lane.b32.xlu1 %v225_v1, %s307_s29  ;;  %v43_v10 = vand.u32 63, %v38_v9  ;;  %255 = vset.pattern.permute.xlu0 %v309_v32  ;;  %s214_s7 = sshll.u32 %s310_s3, 4  ;;  %s215_s7 = int_to_ptr.vmem [resolvable:$true] %s214_s7 }
  0x14   :  { %v178_v28 = vrot.slane %v176_v27, 4  ;;  %s279_s8 = scalar_lea.vmem %s215_s7, 128  ;;  %p284_p6 = scmp.lt.s32.totalorder %s215_s7, %s215_s7 }
  0x15   :  { %v94_v7 = vld [vmem:[#allocation2 + $0x20] sm:$0xf]  ;;  %v55_v11 = vand.u32 7, %v43_v10  ;;  %vm64_vm3 = vcmp.ge.s32.totalorder %v43_v10, 8  ;;  %p280_p5 = scmp.ne.s32.totalorder %s215_s7, %s279_s8  ;;  %p285_p7 = scmp.lt.s32.totalorder %s279_s8, %s279_s8 }
  0x16   :  { %69 = vrot.lane.b32.xlu0 %v224_v5, %s306_s28  ;;  %235 = vmatpush3.msk.msra.mxu0 %vm100_vm0, %v94_v7  ;;  %v92_v23 = vld [vmem:[#allocation2 + $0x10] sm:$0xff] }
  0x17   :  { %236 = vmatprep.subr.mxu0 %v304_v0  ;;  %vm63_vm2 = vcmp.ge.s32.totalorder %v55_v11, 1  ;;  %p286_p8 = por %p285_p7, %p284_p6 }
  0x18   :  { %vm65_vm4 = vmand %vm64_vm3, %vm63_vm2 }
  0x19   :  { %p287_p9 = pnand %p286_p8, %p280_p5 }
  0x80   :  { %v79_v12 = vpop.permute.xlu0 %78 }
  0x81   :  { %v76_v13 = vpop.permute.xlu1 %75  ;;  %v80_v14 = vsel %vm63_vm2, %v79_v12, 0.0 }
  0x82   :  { %v77_v15 = vsel %vm63_vm2, %v76_v13, 0.0  ;;  %87 = vst [vmem:[#allocation2 + $0x18] sm:$0xf] %v80_v14 }
  0x83   :  { %84 = vst [vmem:[#allocation2 + $0xc] sm:$0xf] %v77_v15 }
  0x84   :  { %v73_v16 = vpop.permute.xlu0 %72 }
  0x85   :  { %v67_v17 = vpop.permute.xlu1 %66  ;;  %v74_v18 = vsel %vm64_vm3, %v73_v16, 0.0 }
  0x86   :  { %v68_v19 = vsel %vm65_vm4, %v67_v17, 0.0  ;;  %83 = vst [vmem:[#allocation2 + $0x8] sm:$0xf] %v74_v18 }
  0x87   :  { %81 = vst [vmem:[#allocation2] sm:$0xf] %v68_v19 }
  0x88   :  { %v70_v20 = vpop.permute.xlu0 %69 }
  0x89   :  { %v71_v21 = vsel %vm64_vm3, %v70_v20, 0.0  ;;  %v93_v22 = vld [vmem:[#allocation2 + $0x18] sm:$0xff] }
  0x8a   :  { %82 = vst [vmem:[#allocation2 + $0x4] sm:$0xf] %v71_v21  ;;  %237 = vmatpush3.msra.mxu0 %v93_v22 }
  0x8b   :  { %238 = vmatprep.subr.mxu0 %v304_v0 }
  0x8c   :  { %239 = vmatpush3.msra.mxu0 %v92_v23 }
  0x8d   :  { %240 = vmatprep.subr.mxu0 %v304_v0  ;;  %v91_v24 = vld [vmem:[#allocation2 + $0x8] sm:$0xff] }
  0x8e   :  { %241 = vmatpush3.msra.mxu0 %v91_v24 }
  0x8f   :  { %242 = vmatprep.subr.mxu0 %v304_v0 }
  0x91   :  { %v90_v26 = vld [vmem:[#allocation2] sm:$0xff] }
  0x92   :  { %243 = vmatpush3.msra.mxu0 %v90_v26 }
  0x93   :  { %245 = vmatmul.mubr.msk.f32.vlgmr.msra.gmra.mxu0 %vm96_vm5, %v95_v25 }
 0x153   :  { %v170_v29 = vpop.f32.mrf.mxu0 }
 0x154   :  { %v180_v30 = vsel %vm100_vm0, %v170_v29, %v178_v28 }
 0x155   :  { %181 = vadd.xlane.f32.xlu1 %v180_v30  ;;  %v246_v31 = vpop.f32.mrf.mxu0 }
 0x166   :  { %202 = vperm.xlu1 %256, %v199_v33  }
 0x1de   :  { %v182_v34 = vpop.xlane.xlu1 %181 }
 0x1df   :  { %v183_v35 = vmul.f32 0.0078125, %v182_v34 }
 0x1e1   :  { %v184_v36 = vsub.f32 %v180_v30, %v183_v35 }
 0x1e2   :  { %v203_v45 = vpop.permute.xlu1 %202 }
 0x1e3   :  { %v185_v37 = vmul.f32 %v184_v36, %v184_v36 }
 0x1e5   :  { %186 = vadd.xlane.f32.xlu0 %v185_v37 }
 0x1fb   :  { %195 = vperm.xlu0 %255, %v192_v38  }
 0x26e   :  { %v187_v39 = vpop.xlane.xlu0 %186 }
 0x26f   :  { %v188_v40 = vmul.f32 0.0078125, %v187_v39 }
 0x271   :  { %v189_v41 = vadd.f32 1e-05, %v188_v40 }
 0x273   :  { %257 = vrsqrt.f32 %v189_v41 }
 0x276   :  { %v196_v43 = vpop.permute.xlu0 %195 }
 0x280   :  { %v258_v42 = vpop.eup %257 }
 0x281   :  { %v191_v44 = vmul.f32 %v258_v42, %v184_v36 }
 0x283   :  { %v198_v46 = vmul.f32 %v196_v43, %v191_v44 }
 0x285   :  { %v205_v47 = vadd.f32 %v203_v45, %v198_v46 }
 0x287   :  { %v206_v48 = vmax.f32 %v205_v47, 0.0 }
 0x289   :  { %207 = vst [vmem:[#allocation6] sm:$0xff] %v206_v48 }
 0x28a   :  { %290 = shalt.err (!%p287_p9)
}
 0x28b   :  { %217 = dma.vmem_to_hbm [thread:$0]  %s215_s7, 128, %s366_s4, [#allocation5]  }
 0x28c   :  { %301 = dma.done.wait [#allocation5], 128  }
 0x28d   :  { %302 = vsyncadd [#allocation5], 4294967168 }
 0x28e   :  { %221 = vsyncpa [#allocation4], 1 }
 0x28f   :  { %222 = vsyncpa [#allocation5], 1 }

</bundles_post_ra>
